<compile_context>
chip_gen: v7x
topology: tpu7x:2x2x1
jax: 0.10.0
libtpu: 0.0.40
codegen_flags: <defaults>
</compile_context>

<pallas_src>
import math

import jax
import jax.numpy as jnp
from jax import lax
from jax.experimental import pallas as pl
from jax.experimental.pallas import tpu as pltpu

# ---------------- problem sizes (small, synthetic) ----------------
M = 2        # ensemble size
B = 2        # batch (beam) size
T = 8        # target sequence length (only the last step is used, as in forward_decoder)
H = 32       # decoder hidden size
V = 256      # vocab size (lane-dense: multiple of 128)
S = 16       # source length (attention width)
TEMPERATURE = 1.5

B_PAD = 8    # pad beam dim to the f32 sublane tile -> full VPU/MXU-row utilization
S_PAD = 128  # lane-dense attention output slab (sliced back to S in the wrapper)

INV_TEMP = 1.0 / TEMPERATURE
LOG_M = math.log(M)


def _ensemble_kernel(h_ref, w_ref, enc_ref, probs_ref, attn_ref):
    """Single grid step: statically unrolled loop over the M ensemble members.

    h_ref:   (M, B_PAD, H)   bf16  last-step decoder hidden states
    w_ref:   (M, H, V)       bf16  decoder output projections
    enc_ref: (M, S, H)       bf16  encoder outputs
    probs_ref: (B_PAD, V)     f32  ensembled log-probs
    attn_ref:  (B_PAD, S_PAD) f32  averaged attention (lane-padded)
    """
    prob_acc = jnp.zeros((B_PAD, V), jnp.float32)
    attn_acc = jnp.zeros((B_PAD, S), jnp.float32)

    for m in range(M):  # static, unrolled: whole body visible to the LLO scheduler
        h = h_ref[m]      # (B_PAD, H) bf16
        w = w_ref[m]      # (H, V)     bf16
        enc = enc_ref[m]  # (S, H)     bf16

        # ---- decoder output projection (bf16 MXU inputs, f32 accumulation) ----
        raw = jnp.dot(h, w, preferred_element_type=jnp.float32)       # (B_PAD, V) f32
        mx = jnp.max(raw, axis=-1, keepdims=True)
        # temperature folded into the shift-and-exp pass (multiply, not a separate divide):
        #   softmax(raw / T) == exp((raw - mx) * (1/T)) / sum_k exp((raw_k - mx) * (1/T))
        p = jnp.exp((raw - mx) * INV_TEMP)
        inv_denom = 1.0 / jnp.sum(p, axis=-1, keepdims=True)           # (B_PAD, 1) exact divide
        prob_acc = prob_acc + p * inv_denom                            # sum_i softmax_i

        # ---- attention for the last decoding step: contract H on both sides, no transpose ----
        scores = lax.dot_general(
            h, enc, dimension_numbers=(((1,), (1,)), ((), ())),
            preferred_element_type=jnp.float32)                        # (B_PAD, S) f32
        smx = jnp.max(scores, axis=-1, keepdims=True)
        q = jnp.exp(scores - smx)
        attn_acc = attn_acc + q * (1.0 / jnp.sum(q, axis=-1, keepdims=True))

    # ---- finalize: log(mean of softmax) == logsumexp_i(log_softmax_i) - log(M) ----
    probs_ref[...] = jnp.log(prob_acc) - jnp.float32(LOG_M)
    attn_ref[...] = jnp.zeros_like(attn_ref)
    attn_ref[:, :S] = attn_acc * jnp.float32(1.0 / M)


def ensemble_forward_decoder(h_last, weights, enc_outs):
    """h_last: (M, B, H) bf16, weights: (M, H, V) bf16, enc_outs: (M, S, H) bf16."""
    b = h_last.shape[1]
    # layout plumbing only: pad beam dim to the 8-sublane tile
    h_pad = jnp.pad(h_last, ((0, 0), (0, B_PAD - b), (0, 0)))

    # TODO(synk): for realistic vocab sizes (M*H*V no longer VMEM-resident) restore a grid over
    # (V-blocks marked "parallel", models marked "arbitrary") with a two-pass / online softmax
    # over the V blocks -- the per-model softmax normalizer spans the full vocab, so it cannot
    # stay local to a V block in this single-pass form.
    grid_spec = pltpu.PrefetchScalarGridSpec(
        num_scalar_prefetch=0,
        grid=(1,),
        in_specs=[
            pl.BlockSpec((M, B_PAD, H), lambda i: (0, 0, 0)),
            pl.BlockSpec((M, H, V), lambda i: (0, 0, 0)),
            pl.BlockSpec((M, S, H), lambda i: (0, 0, 0)),
        ],
        out_specs=[
            pl.BlockSpec((B_PAD, V), lambda i: (0, 0)),
            pl.BlockSpec((B_PAD, S_PAD), lambda i: (0, 0)),
        ],
    )
    probs, attn = pl.pallas_call(
        _ensemble_kernel,
        grid_spec=grid_spec,
        out_shape=(
            jax.ShapeDtypeStruct((B_PAD, V), jnp.float32),
            jax.ShapeDtypeStruct((B_PAD, S_PAD), jnp.float32),
        ),
        compiler_params=pltpu.CompilerParams(
            dimension_semantics=("arbitrary",)),
    )(h_pad, weights, enc_outs)
    return probs[:b], attn[:b, :S]


def reference_forward_decoder(tokens, embeddings, weights, enc_outs):
    """Pure-JAX reference reproducing forward_decoder of EnsembleModel (f32 math on bf16 params)."""
    log_probs, attns = [], []
    for i in range(M):
        hid = embeddings[i].astype(jnp.float32)[tokens]     # (B, T, H) toy decoder hidden
        h_last = hid[:, -1, :]                              # take last step
        w = weights[i].astype(jnp.float32)
        enc = enc_outs[i].astype(jnp.float32)
        logits = (h_last @ w) / TEMPERATURE
        log_probs.append(jax.nn.log_softmax(logits, axis=-1))
        attns.append(jax.nn.softmax(h_last @ enc.T, axis=-1))
    avg_probs = jax.nn.logsumexp(jnp.stack(log_probs, axis=0), axis=0) - math.log(M)
    avg_attn = jnp.sum(jnp.stack(attns, axis=0), axis=0) / M
    return avg_probs, avg_attn


if __name__ == "__main__":
    key = jax.random.PRNGKey(0)
    k_tok, k_emb, k_w, k_enc = jax.random.split(key, 4)

    # deterministic synthetic "ensemble" parameters, stored/streamed as bf16
    tokens = jax.random.randint(k_tok, (B, T), 0, V, dtype=jnp.int32)
    embeddings = (0.1 * jax.random.normal(k_emb, (M, V, H), jnp.float32)).astype(jnp.bfloat16)
    weights = (0.1 * jax.random.normal(k_w, (M, H, V), jnp.float32)).astype(jnp.bfloat16)
    enc_outs = (0.1 * jax.random.normal(k_enc, (M, S, H), jnp.float32)).astype(jnp.bfloat16)

    # glue (plain JAX): per-model embedding lookup + last-step slice
    h_last = jnp.stack([embeddings[i][tokens][:, -1, :] for i in range(M)],
                       axis=0)                              # (M, B, H) bf16

    avg_probs, avg_attn = ensemble_forward_decoder(h_last, weights, enc_outs)
    jax.block_until_ready((avg_probs, avg_attn))

    ref_probs, ref_attn = reference_forward_decoder(tokens, embeddings, weights, enc_outs)

    assert jnp.allclose(avg_probs, ref_probs, atol=1e-4, rtol=1e-4), "probs mismatch"
    assert jnp.allclose(avg_attn, ref_attn, atol=1e-4, rtol=1e-4), "attn mismatch"
    print("KERNEL_OK")
</pallas_src>

<mosaic_0001>
module attributes {stable_mosaic.version = 11 : i64} {
  func.func @_ensemble_kernel(%arg0: i32, %arg1: memref<2x8x32xbf16, #tpu.memory_space<vmem>>, %arg2: memref<2x32x256xbf16, #tpu.memory_space<vmem>>, %arg3: memref<2x16x32xbf16, #tpu.memory_space<vmem>>, %arg4: memref<8x256xf32, #tpu.memory_space<vmem>>, %arg5: memref<8x128xf32, #tpu.memory_space<vmem>>) attributes {dimension_semantics = [#tpu.dimension_semantics<arbitrary>], iteration_bounds = array<i64: 1>, scalar_prefetch = 0 : i64, scratch_operands = 0 : i64, tpu.core_type = #tpu.core_type<tc>, window_params = [{pipeline_mode = #tpu.pipeline_mode<synchronous>, transform_indices = @transform_0, window_bounds = array<i64: 2, 8, 32>}, {pipeline_mode = #tpu.pipeline_mode<synchronous>, transform_indices = @transform_1, window_bounds = array<i64: 2, 32, 256>}, {pipeline_mode = #tpu.pipeline_mode<synchronous>, transform_indices = @transform_2, window_bounds = array<i64: 2, 16, 32>}, {pipeline_mode = #tpu.pipeline_mode<synchronous>, transform_indices = @transform_3, window_bounds = array<i64: 8, 256>}, {pipeline_mode = #tpu.pipeline_mode<synchronous>, transform_indices = @transform_4, window_bounds = array<i64: 8, 128>}]} {
    %cst = arith.constant 0.000000e+00 : f32
    %0 = vector.broadcast %cst : f32 to vector<8x256xf32>
    %cst_0 = arith.constant 0.000000e+00 : f32
    %1 = vector.broadcast %cst_0 : f32 to vector<8x16xf32>
    %c0 = arith.constant 0 : index
    %c0_1 = arith.constant 0 : index
    %c0_2 = arith.constant 0 : index
    %2 = vector.load %arg1[%c0, %c0_1, %c0_2] : memref<2x8x32xbf16, #tpu.memory_space<vmem>>, vector<1x8x32xbf16>
    %3 = vector.shape_cast %2 : vector<1x8x32xbf16> to vector<8x32xbf16>
    %c0_3 = arith.constant 0 : index
    %c0_4 = arith.constant 0 : index
    %c0_5 = arith.constant 0 : index
    %4 = vector.load %arg2[%c0_3, %c0_4, %c0_5] : memref<2x32x256xbf16, #tpu.memory_space<vmem>>, vector<1x32x256xbf16>
    %5 = vector.shape_cast %4 : vector<1x32x256xbf16> to vector<32x256xbf16>
    %c0_6 = arith.constant 0 : index
    %c0_7 = arith.constant 0 : index
    %c0_8 = arith.constant 0 : index
    %6 = vector.load %arg3[%c0_6, %c0_7, %c0_8] : memref<2x16x32xbf16, #tpu.memory_space<vmem>>, vector<1x16x32xbf16>
    %7 = vector.shape_cast %6 : vector<1x16x32xbf16> to vector<16x32xbf16>
    %cst_9 = arith.constant dense<0.000000e+00> : vector<8x256xf32>
    %8 = tpu.matmul %3, %5, %cst_9 {dimension_numbers = #tpu.dot_dimension_numbers<[1], [0], [0], [1], [0, 0, 1, 1], [], []>} : vector<8x32xbf16>, vector<32x256xbf16>, vector<8x256xf32> -> vector<8x256xf32>
    %cst_10 = arith.constant dense<0xFF800000> : vector<8xf32>
    %9 = vector.multi_reduction <maximumf>, %8, %cst_10 [1] : vector<8x256xf32> to vector<8xf32>
    %10 = vector.shape_cast %9 : vector<8xf32> to vector<8x1xf32>
    %11 = vector.broadcast %10 : vector<8x1xf32> to vector<8x256xf32>
    %12 = arith.subf %8, %11 : vector<8x256xf32>
    %cst_11 = arith.constant 0.666666686 : f32
    %13 = vector.broadcast %cst_11 : f32 to vector<8x256xf32>
    %14 = arith.mulf %12, %13 : vector<8x256xf32>
    %15 = math.exp %14 : vector<8x256xf32>
    %cst_12 = arith.constant dense<0.000000e+00> : vector<8xf32>
    %16 = vector.multi_reduction <add>, %15, %cst_12 [1] : vector<8x256xf32> to vector<8xf32>
    %17 = vector.shape_cast %16 : vector<8xf32> to vector<8x1xf32>
    %cst_13 = arith.constant 1.000000e+00 : f32
    %18 = vector.broadcast %cst_13 : f32 to vector<8x1xf32>
    %19 = arith.divf %18, %17 : vector<8x1xf32>
    %20 = vector.broadcast %19 : vector<8x1xf32> to vector<8x256xf32>
    %21 = arith.mulf %15, %20 : vector<8x256xf32>
    %22 = arith.addf %0, %21 : vector<8x256xf32>
    %cst_14 = arith.constant dense<0.000000e+00> : vector<8x16xf32>
    %23 = tpu.matmul %3, %7, %cst_14 {dimension_numbers = #tpu.dot_dimension_numbers<[1], [1], [0], [0], [0, 0, 1, 0], [], []>} : vector<8x32xbf16>, vector<16x32xbf16>, vector<8x16xf32> -> vector<8x16xf32>
    %cst_15 = arith.constant dense<0xFF800000> : vector<8xf32>
    %24 = vector.multi_reduction <maximumf>, %23, %cst_15 [1] : vector<8x16xf32> to vector<8xf32>
    %25 = vector.shape_cast %24 : vector<8xf32> to vector<8x1xf32>
    %26 = vector.broadcast %25 : vector<8x1xf32> to vector<8x16xf32>
    %27 = arith.subf %23, %26 : vector<8x16xf32>
    %28 = math.exp %27 : vector<8x16xf32>
    %cst_16 = arith.constant dense<0.000000e+00> : vector<8xf32>
    %29 = vector.multi_reduction <add>, %28, %cst_16 [1] : vector<8x16xf32> to vector<8xf32>
    %30 = vector.shape_cast %29 : vector<8xf32> to vector<8x1xf32>
    %cst_17 = arith.constant 1.000000e+00 : f32
    %31 = vector.broadcast %cst_17 : f32 to vector<8x1xf32>
    %32 = arith.divf %31, %30 : vector<8x1xf32>
    %33 = vector.broadcast %32 : vector<8x1xf32> to vector<8x16xf32>
    %34 = arith.mulf %28, %33 : vector<8x16xf32>
    %35 = arith.addf %1, %34 : vector<8x16xf32>
    %c1 = arith.constant 1 : index
    %c0_18 = arith.constant 0 : index
    %c0_19 = arith.constant 0 : index
    %36 = vector.load %arg1[%c1, %c0_18, %c0_19] : memref<2x8x32xbf16, #tpu.memory_space<vmem>>, vector<1x8x32xbf16>
    %37 = vector.shape_cast %36 : vector<1x8x32xbf16> to vector<8x32xbf16>
    %c1_20 = arith.constant 1 : index
    %c0_21 = arith.constant 0 : index
    %c0_22 = arith.constant 0 : index
    %38 = vector.load %arg2[%c1_20, %c0_21, %c0_22] : memref<2x32x256xbf16, #tpu.memory_space<vmem>>, vector<1x32x256xbf16>
    %39 = vector.shape_cast %38 : vector<1x32x256xbf16> to vector<32x256xbf16>
    %c1_23 = arith.constant 1 : index
    %c0_24 = arith.constant 0 : index
    %c0_25 = arith.constant 0 : index
    %40 = vector.load %arg3[%c1_23, %c0_24, %c0_25] : memref<2x16x32xbf16, #tpu.memory_space<vmem>>, vector<1x16x32xbf16>
    %41 = vector.shape_cast %40 : vector<1x16x32xbf16> to vector<16x32xbf16>
    %cst_26 = arith.constant dense<0.000000e+00> : vector<8x256xf32>
    %42 = tpu.matmul %37, %39, %cst_26 {dimension_numbers = #tpu.dot_dimension_numbers<[1], [0], [0], [1], [0, 0, 1, 1], [], []>} : vector<8x32xbf16>, vector<32x256xbf16>, vector<8x256xf32> -> vector<8x256xf32>
    %cst_27 = arith.constant dense<0xFF800000> : vector<8xf32>
    %43 = vector.multi_reduction <maximumf>, %42, %cst_27 [1] : vector<8x256xf32> to vector<8xf32>
    %44 = vector.shape_cast %43 : vector<8xf32> to vector<8x1xf32>
    %45 = vector.broadcast %44 : vector<8x1xf32> to vector<8x256xf32>
    %46 = arith.subf %42, %45 : vector<8x256xf32>
    %cst_28 = arith.constant 0.666666686 : f32
    %47 = vector.broadcast %cst_28 : f32 to vector<8x256xf32>
    %48 = arith.mulf %46, %47 : vector<8x256xf32>
    %49 = math.exp %48 : vector<8x256xf32>
    %cst_29 = arith.constant dense<0.000000e+00> : vector<8xf32>
    %50 = vector.multi_reduction <add>, %49, %cst_29 [1] : vector<8x256xf32> to vector<8xf32>
    %51 = vector.shape_cast %50 : vector<8xf32> to vector<8x1xf32>
    %cst_30 = arith.constant 1.000000e+00 : f32
    %52 = vector.broadcast %cst_30 : f32 to vector<8x1xf32>
    %53 = arith.divf %52, %51 : vector<8x1xf32>
    %54 = vector.broadcast %53 : vector<8x1xf32> to vector<8x256xf32>
    %55 = arith.mulf %49, %54 : vector<8x256xf32>
    %56 = arith.addf %22, %55 : vector<8x256xf32>
    %cst_31 = arith.constant dense<0.000000e+00> : vector<8x16xf32>
    %57 = tpu.matmul %37, %41, %cst_31 {dimension_numbers = #tpu.dot_dimension_numbers<[1], [1], [0], [0], [0, 0, 1, 0], [], []>} : vector<8x32xbf16>, vector<16x32xbf16>, vector<8x16xf32> -> vector<8x16xf32>
    %cst_32 = arith.constant dense<0xFF800000> : vector<8xf32>
    %58 = vector.multi_reduction <maximumf>, %57, %cst_32 [1] : vector<8x16xf32> to vector<8xf32>
    %59 = vector.shape_cast %58 : vector<8xf32> to vector<8x1xf32>
    %60 = vector.broadcast %59 : vector<8x1xf32> to vector<8x16xf32>
    %61 = arith.subf %57, %60 : vector<8x16xf32>
    %62 = math.exp %61 : vector<8x16xf32>
    %cst_33 = arith.constant dense<0.000000e+00> : vector<8xf32>
    %63 = vector.multi_reduction <add>, %62, %cst_33 [1] : vector<8x16xf32> to vector<8xf32>
    %64 = vector.shape_cast %63 : vector<8xf32> to vector<8x1xf32>
    %cst_34 = arith.constant 1.000000e+00 : f32
    %65 = vector.broadcast %cst_34 : f32 to vector<8x1xf32>
    %66 = arith.divf %65, %64 : vector<8x1xf32>
    %67 = vector.broadcast %66 : vector<8x1xf32> to vector<8x16xf32>
    %68 = arith.mulf %62, %67 : vector<8x16xf32>
    %69 = arith.addf %35, %68 : vector<8x16xf32>
    %70 = math.log %56 : vector<8x256xf32>
    %cst_35 = arith.constant 0.693147182 : f32
    %71 = vector.broadcast %cst_35 : f32 to vector<8x256xf32>
    %72 = arith.subf %70, %71 : vector<8x256xf32>
    %c0_36 = arith.constant 0 : index
    %c0_37 = arith.constant 0 : index
    %73 = vector.load %arg4[%c0_36, %c0_37] : memref<8x256xf32, #tpu.memory_space<vmem>>, vector<8x256xf32>
    tpu.vector_store %arg4[%c0_36, %c0_37], %72 {strides = array<i32>} : memref<8x256xf32, #tpu.memory_space<vmem>>, vector<8x256xf32>,
    %cst_38 = arith.constant 0.000000e+00 : f32
    %74 = vector.broadcast %cst_38 : f32 to vector<8x128xf32>
    %c0_39 = arith.constant 0 : index
    %c0_40 = arith.constant 0 : index
    %75 = vector.load %arg5[%c0_39, %c0_40] : memref<8x128xf32, #tpu.memory_space<vmem>>, vector<8x128xf32>
    tpu.vector_store %arg5[%c0_39, %c0_40], %74 {strides = array<i32>} : memref<8x128xf32, #tpu.memory_space<vmem>>, vector<8x128xf32>,
    %cst_41 = arith.constant 5.000000e-01 : f32
    %76 = vector.broadcast %cst_41 : f32 to vector<8x16xf32>
    %77 = arith.mulf %69, %76 : vector<8x16xf32>
    %c0_42 = arith.constant 0 : index
    %c0_43 = arith.constant 0 : index
    %78 = vector.load %arg5[%c0_42, %c0_43] : memref<8x128xf32, #tpu.memory_space<vmem>>, vector<8x16xf32>
    tpu.vector_store %arg5[%c0_42, %c0_43], %77 {strides = array<i32>} : memref<8x128xf32, #tpu.memory_space<vmem>>, vector<8x16xf32>,
    return
  }
  func.func @transform_0(%arg0: i32) -> (i32, i32, i32) {
    %c0_i32 = arith.constant 0 : i32
    %c0_i32_0 = arith.constant 0 : i32
    %c0_i32_1 = arith.constant 0 : i32
    %c0_i32_2 = arith.constant 0 : i32
    return %c0_i32, %c0_i32_0, %c0_i32_1 : i32, i32, i32
  }
  func.func @transform_1(%arg0: i32) -> (i32, i32, i32) {
    %c0_i32 = arith.constant 0 : i32
    %c0_i32_0 = arith.constant 0 : i32
    %c0_i32_1 = arith.constant 0 : i32
    %c0_i32_2 = arith.constant 0 : i32
    return %c0_i32, %c0_i32_0, %c0_i32_1 : i32, i32, i32
  }
  func.func @transform_2(%arg0: i32) -> (i32, i32, i32) {
    %c0_i32 = arith.constant 0 : i32
    %c0_i32_0 = arith.constant 0 : i32
    %c0_i32_1 = arith.constant 0 : i32
    %c0_i32_2 = arith.constant 0 : i32
    return %c0_i32, %c0_i32_0, %c0_i32_1 : i32, i32, i32
  }
  func.func @transform_3(%arg0: i32) -> (i32, i32) {
    %c0_i32 = arith.constant 0 : i32
    %c0_i32_0 = arith.constant 0 : i32
    %c0_i32_1 = arith.constant 0 : i32
    return %c0_i32, %c0_i32_0 : i32, i32
  }
  func.func @transform_4(%arg0: i32) -> (i32, i32) {
    %c0_i32 = arith.constant 0 : i32
    %c0_i32_0 = arith.constant 0 : i32
    %c0_i32_1 = arith.constant 0 : i32
    return %c0_i32, %c0_i32_0 : i32, i32
  }
}

</mosaic_0001>

<bundles_post_ra>
// kernel: tpu_custom_call.1
= control target key start
LH: loop header
LB: loop body
LE: loop exit
PB: predicated region body
PF: predicated region fallthrough
CT: control target
= control target key end

     0   :  { %10 = vsyncpa [#allocation3], 0  ;;  %s720_s0 = inlined_call_operand.hbm [shape: bf16[2,8,32], index: 0, kind: input, shape index: {}]   ;;  %s721_s1 = inlined_call_operand.hbm [shape: bf16[2,32,256], index: 1, kind: input, shape index: {}]   ;;  %s722_s2 = inlined_call_operand.hbm [shape: bf16[2,16,32], index: 2, kind: input, shape index: {}]   ;;  %s723_s3 = inlined_call_operand.hbm [shape: f32[8,256], index: 3, kind: output, shape index: {0}]   ;;  %s724_s4 = inlined_call_operand.hbm [shape: f32[8,128], index: 4, kind: output, shape index: {1}]  }
   0x1   :  { %11 = vsyncpa [#allocation6], 0 }
   0x2   :  { %12 = vsyncpa [#allocation4], 0 }
   0x3   :  { %13 = vsyncpa [#allocation10], 0  ;;  %s610_s15 = smov [#allocation5]   ;;  %s492_s19 = scalar_lea.hbm %s721_s1, 1024 }
   0x4   :  { %s31_s16 = sshll.u32 %s610_s15, 4  ;;  %p493_p0 = scmp.ne.s32.totalorder %s721_s1, %s492_s19  ;;  %s32_s16 = int_to_ptr.vmem [resolvable:$true] %s31_s16 }
   0x5   :  { %p496_p1 = scmp.lt.u32.totalorder %s492_s19, %s721_s1 }
   0x7   :  { %p498_p2 = pnand %p496_p1, %p493_p0 }
   0x9   :  { %501 = shalt.err (!%p498_p2)
}
   0xa   :  { %s502_s24 = scalar_lea.vmem %s32_s16, 1024  ;;  %p507_p4 = scmp.lt.s32.totalorder %s32_s16, %s32_s16 }
   0xb   :  { %p503_p3 = scmp.ne.s32.totalorder %s32_s16, %s502_s24  ;;  %p508_p5 = scmp.lt.s32.totalorder %s502_s24, %s502_s24 }
   0xd   :  { %p509_p6 = por %p508_p5, %p507_p4 }
   0xf   :  { %p510_p7 = pnand %p509_p6, %p503_p3 }
  0x11   :  { %513 = shalt.err (!%p510_p7)
}
  0x12   :  { %s611_s25 = smov 128   ;;  %s612_s26 = smov 8  }
  0x13   :  { %37 = dma.hbm_to_vmem [thread:$0]  %s721_s1, 1024, %s32_s16, [#allocation6], %s611_s25, %s611_s25, %s612_s26  }
  0x14   :  { %s613_s29 = smov [#allocation2]   ;;  %s514_s7 = scalar_lea.hbm %s720_s0, 128 }
  0x15   :  { %s19_s30 = sshll.u32 %s613_s29, 4  ;;  %p515_p8 = scmp.ne.s32.totalorder %s720_s0, %s514_s7  ;;  %s20_s30 = int_to_ptr.vmem [resolvable:$true] %s19_s30 }
  0x16   :  { %p518_p9 = scmp.lt.u32.totalorder %s514_s7, %s720_s0 }
  0x18   :  { %p520_p10 = pnand %p518_p9, %p515_p8 }
  0x1a   :  { %523 = shalt.err (!%p520_p10)
}
  0x1b   :  { %s524_s12 = scalar_lea.vmem %s20_s30, 128  ;;  %p529_p12 = scmp.lt.s32.totalorder %s20_s30, %s20_s30 }
  0x1c   :  { %p525_p11 = scmp.ne.s32.totalorder %s20_s30, %s524_s12  ;;  %p530_p13 = scmp.lt.s32.totalorder %s524_s12, %s524_s12 }
  0x1e   :  { %p531_p0 = por %p530_p13, %p529_p12 }
  0x20   :  { %p532_p1 = pnand %p531_p0, %p525_p11 }
  0x22   :  { %535 = shalt.err (!%p532_p1)
}
  0x23   :  { %s614_s1 = smov 64   ;;  %s615_s13 = smov 4  }
  0x24   :  { %25 = dma.hbm_to_vmem [thread:$0]  %s720_s0, 128, %s20_s30, [#allocation3], %s614_s1, %s614_s1, %s615_s13  }
  0x25   :  { %s616_s16 = smov [#allocation7]   ;;  %s536_s20 = scalar_lea.hbm %s722_s2, 256 }
  0x26   :  { %s43_s17 = sshll.u32 %s616_s16, 4  ;;  %p537_p2 = scmp.ne.s32.totalorder %s722_s2, %s536_s20  ;;  %s44_s17 = int_to_ptr.vmem [resolvable:$true] %s43_s17 }
  0x27   :  { %p540_p3 = scmp.lt.u32.totalorder %s536_s20, %s722_s2 }
  0x29   :  { %p542_p4 = pnand %p540_p3, %p537_p2 }
  0x2b   :  { %545 = shalt.err (!%p542_p4)
}
  0x2c   :  { %s546_s25 = scalar_lea.vmem %s44_s17, 256  ;;  %p551_p6 = scmp.lt.s32.totalorder %s44_s17, %s44_s17 }
  0x2d   :  { %p547_p5 = scmp.ne.s32.totalorder %s44_s17, %s546_s25  ;;  %p552_p7 = scmp.lt.s32.totalorder %s546_s25, %s546_s25 }
  0x2f   :  { %p553_p8 = por %p552_p7, %p551_p6 }
  0x31   :  { %p554_p9 = pnand %p553_p8, %p547_p5 }
  0x33   :  { %557 = shalt.err (!%p554_p9)
}
  0x34   :  { %49 = dma.hbm_to_vmem [thread:$0]  %s722_s2, 256, %s44_s17, [#allocation6], %s614_s1, %s614_s1, %s615_s13  }
  0x35   :  { %602 = dma.done.wait [#allocation3], 128  }
  0x36   :  { %603 = vsyncadd [#allocation3], 4294967168 }
  0x37   :  { %604 = dma.done.wait [#allocation6], 1280  }
  0x38   :  { %605 = vsyncadd [#allocation6], 4294966016  ;;  %v617_v0 = vmov 0.0   ;;  %v618_v1 = vmov 0   ;;  %vm619_vm0 = vmmov 0   ;;  %vm87_vm1 = vcmask 261120  }
  0x39   :  { %430 = vmatprep.subr.bf16.mxu1 %v617_v0  ;;  %377 = vst [vmem:[#allocation9] sm:$0xff] %v617_v0  ;;  %123 = vmatprep.mubr.bf16.mxu0 %v618_v1  ;;  %v454_v2 = vld [vmem:[#allocation5 + $0x4] ss:$8 sps:$4 sm:$0xff]   ;;  %v456_v3 = vld [vmem:[#allocation5] ss:$8 sps:$4 sm:$0xff]   ;;  %vm200_vm2 = vcmask 130048  }
  0x3a   :  { %432 = vmatprep.mubr.msk.bf16.mxu1 %vm619_vm0, %v617_v0  ;;  %91 = vmatprep.subr.bf16.mxu0 %v454_v2  ;;  %v457_v4 = vld [vmem:[#allocation7] sm:$0xff]   ;;  %v458_v5 = vld [vmem:[#allocation5 + $0x14] ss:$8 sps:$4 sm:$0xff]   ;;  %v460_v6 = vld [vmem:[#allocation5 + $0x10] ss:$8 sps:$4 sm:$0xff]   ;;  %s620_s2 = smov [#allocation9]  }
  0x3b   :  { %92 = vmatpush1.bf16.msra.mxu0 %v456_v3  ;;  %v158_v7 = vsel %vm87_vm1, %v457_v4, 0  ;;  %v463_v8 = vld [vmem:[#allocation5 + $0x24] ss:$8 sps:$4 sm:$0xff]   ;;  %v60_v10 = vld [vmem:[#allocation2] sm:$0xf]  ;;  %s396_s27 = sshll.u32 %s620_s2, 4  ;;  %s397_s27 = int_to_ptr.vmem [resolvable:$true] %s396_s27 }
  0x3c   :  { %431 = vmatpush3.bf16.xpose.msra.mxu1 %v158_v7  ;;  %93 = vmatprep.subr.bf16.mxu0 %v458_v5  ;;  %v464_v9 = vld [vmem:[#allocation7 + $0x8] sm:$0xff]   ;;  %v467_v12 = vld [vmem:[#allocation5 + $0x34] ss:$8 sps:$4 sm:$0xff]   ;;  %v465_v14 = vld [vmem:[#allocation5 + $0x30] ss:$8 sps:$4 sm:$0xff]   ;;  %s558_s28 = scalar_lea.vmem %s397_s27, 128  ;;  %p563_p11 = scmp.lt.s32.totalorder %s397_s27, %s397_s27 }
  0x3d   :  { %436 = vmatprep.subr.bf16.mxu1 %v617_v0  ;;  %v461_v11 = vld [vmem:[#allocation5 + $0x20] ss:$8 sps:$4 sm:$0xff]   ;;  %v314_v13 = vsel %vm87_vm1, %v464_v9, 0  ;;  %v215_v15 = vld [vmem:[#allocation2 + $0x4] sm:$0xf]  ;;  %p559_p10 = scmp.ne.s32.totalorder %s397_s27, %s558_s28  ;;  %p564_p12 = scmp.lt.s32.totalorder %s558_s28, %s558_s28 }
  0x3f   :  { %94 = vmatpush1.bf16.msra.mxu0 %v460_v6  ;;  %p565_p13 = por %p564_p12, %p563_p11 }
  0x40   :  { %247 = vmatprep.subr.bf16.mxu0 %v463_v8 }
  0x41   :  { %p566_p0 = pnand %p565_p13, %p559_p10 }
  0x42   :  { %414 = vmatmul.mubr.msk.bf16.vlgmr.msra.gmra.mrb[0].mxu0 %vm87_vm1, %v60_v10 }
  0x43   :  { %248 = vmatpush1.bf16.msra.mxu0 %v461_v11  ;;  %279 = vmatprep.mubr.bf16.mxu0 %v618_v1 }
  0x44   :  { %433 = vmatmul.mubr.msk.bf16.vlgmr.msra.gmra.mrb[0].mxu1 %vm87_vm1, %v60_v10  ;;  %249 = vmatprep.subr.bf16.mxu0 %v467_v12 }
  0x45   :  { %437 = vmatpush3.bf16.xpose.msra.mxu1 %v314_v13  ;;  %438 = vmatprep.mubr.msk.bf16.mxu1 %vm619_vm0, %v617_v0 }
  0x47   :  { %250 = vmatpush1.bf16.msra.mxu0 %v465_v14 }
  0x4a   :  { %421 = vmatmul.mubr.msk.bf16.vlgmr.msra.gmra.mrb[4].mxu0 %vm87_vm1, %v215_v15 }
  0x4c   :  { %439 = vmatmul.mubr.msk.bf16.vlgmr.msra.gmra.mrb[4].mxu1 %vm87_vm1, %v215_v15 }
 0x115   :  { %v125_v16 = vpop.f32.mrb[0].mxu0 }
 0x116   :  { %v127_v17 = vpop.f32.mrb[1].mxu0 }
 0x117   :  { %v194_v18 = vpop.f32.mrb[0].mxu1  ;;  %v129_v19 = vpop.f32.mrb[2].mxu0  ;;  %v132_v20 = vmax.f32 %v125_v16, %v127_v17 }
 0x118   :  { %v201_v21 = vsel %vm200_vm2, %v194_v18, -inf  ;;  %v130_v22 = vpop.f32.mrb[3].mxu0  ;;  %v434_v23 = vpop.f32.mrb[1].mxu1 }
 0x119   :  { %202 = vmax.xlane.f32.xlu1 %v201_v21  ;;  %133 = vmax.xlane.f32.xlu0 %v132_v20  ;;  %v197_v24 = vpop.f32.mrb[2].mxu1 }
 0x11a   :  { %v435_v25 = vpop.f32.mrb[3].mxu1 }
 0x11d   :  { %v281_v26 = vpop.f32.mrb[4].mxu0 }
 0x11e   :  { %v283_v27 = vpop.f32.mrb[5].mxu0 }
 0x11f   :  { %v350_v28 = vpop.f32.mrb[4].mxu1  ;;  %v285_v29 = vpop.f32.mrb[6].mxu0  ;;  %v288_v30 = vmax.f32 %v281_v26, %v283_v27 }
 0x120   :  { %v356_v31 = vsel %vm200_vm2, %v350_v28, -inf  ;;  %v286_v32 = vpop.f32.mrb[7].mxu0  ;;  %v440_v33 = vpop.f32.mrb[5].mxu1 }
 0x121   :  { %357 = vmax.xlane.f32.xlu1 %v356_v31  ;;  %289 = vmax.xlane.f32.xlu0 %v288_v30  ;;  %v353_v34 = vpop.f32.mrb[6].mxu1 }
 0x122   :  { %v441_v35 = vpop.f32.mrb[7].mxu1 }
 0x1a6   :  { %v203_v36 = vpop.xlane.xlu1 %202  ;;  %v134_v37 = vpop.xlane.xlu0 %133 }
 0x1a7   :  { %v135_v38 = vsub.f32 %v125_v16, %v134_v37  ;;  %v136_v39 = vsub.f32 %v127_v17, %v134_v37  ;;  %v204_v40 = vsub.f32 %v194_v18, %v203_v36 }
 0x1a9   :  { %v137_v41 = vmul.f32 0.6666667, %v135_v38  ;;  %v138_v42 = vmul.f32 0.6666667, %v136_v39  ;;  %v205_v45 = vmul.f32 1.442695, %v204_v40 }
 0x1ab   :  { %v139_v43 = vmul.f32 1.442695, %v137_v41  ;;  %v141_v44 = vmul.f32 1.442695, %v138_v42 }
 0x1ad   :  { %468 = vpow2.f32 %v139_v43 }
 0x1ae   :  { %470 = vpow2.f32 %v141_v44  ;;  %v358_v46 = vpop.xlane.xlu1 %357  ;;  %v290_v47 = vpop.xlane.xlu0 %289 }
 0x1af   :  { %v291_v48 = vsub.f32 %v281_v26, %v290_v47  ;;  %v292_v49 = vsub.f32 %v283_v27, %v290_v47  ;;  %472 = vpow2.f32 %v205_v45  ;;  %v359_v50 = vsub.f32 %v350_v28, %v358_v46 }
 0x1b1   :  { %v293_v51 = vmul.f32 0.6666667, %v291_v48  ;;  %v294_v52 = vmul.f32 0.6666667, %v292_v49  ;;  %v360_v55 = vmul.f32 1.442695, %v359_v50 }
 0x1b3   :  { %v295_v53 = vmul.f32 1.442695, %v293_v51  ;;  %v297_v54 = vmul.f32 1.442695, %v294_v52 }
 0x1b5   :  { %474 = vpow2.f32 %v295_v53 }
 0x1b6   :  { %476 = vpow2.f32 %v297_v54 }
 0x1b7   :  { %v469_v56 = vpop.eup %468  ;;  %478 = vpow2.f32 %v360_v55 }
 0x1b8   :  { %v471_v57 = vpop.eup %470 }
 0x1b9   :  { %v143_v58 = vadd.f32 %v471_v57, %v469_v56  ;;  %v473_v59 = vpop.eup %472 }
 0x1ba   :  { %v207_v60 = vsel %vm200_vm2, %v473_v59, 0.0 }
 0x1bb   :  { %144 = vadd.xlane.f32.xlu0 %v143_v58 }
 0x1bf   :  { %v475_v61 = vpop.eup %474  ;;  %208 = vadd.xlane.f32.xlu0 %v207_v60 }
 0x1c0   :  { %v477_v62 = vpop.eup %476 }
 0x1c1   :  { %v299_v63 = vadd.f32 %v477_v62, %v475_v61  ;;  %v479_v0 = vpop.eup %478 }
 0x1c2   :  { %v362_v1 = vsel %vm200_vm2, %v479_v0, 0.0 }
 0x1c3   :  { %300 = vadd.xlane.f32.xlu1 %v299_v63 }
 0x1c7   :  { %363 = vadd.xlane.f32.xlu1 %v362_v1 }
 0x248   :  { %v145_v2 = vpop.xlane.xlu0 %144 }
 0x249   :  { %480 = vrcp.f32 %v145_v2 }
 0x24c   :  { %v209_v3 = vpop.xlane.xlu0 %208 }
 0x250   :  { %v301_v4 = vpop.xlane.xlu1 %300 }
 0x251   :  { %482 = vrcp.f32 %v301_v4 }
 0x252   :  { %484 = vrcp.f32 %v209_v3 }
 0x253   :  { %v481_v6 = vpop.eup %480 }
 0x254   :  { %v364_v5 = vpop.xlane.xlu1 %363  ;;  %v148_v8 = vmul.f32 %v481_v6, %v469_v56  ;;  %v149_v9 = vmul.f32 %v481_v6, %v471_v57 }
 0x255   :  { %486 = vrcp.f32 %v364_v5 }
 0x25b   :  { %v483_v7 = vpop.eup %482 }
 0x25c   :  { %v304_v10 = vmul.f32 %v483_v7, %v475_v61  ;;  %v305_v11 = vmul.f32 %v483_v7, %v477_v62  ;;  %v485_v12 = vpop.eup %484 }
 0x25d   :  { %v212_v16 = vmul.f32 %v485_v12, %v473_v59 }
 0x25e   :  { %v306_v13 = vadd.f32 %v304_v10, %v148_v8  ;;  %v307_v14 = vadd.f32 %v305_v11, %v149_v9 }
 0x25f   :  { %v487_v15 = vpop.eup %486 }
 0x260   :  { %v367_v17 = vmul.f32 %v487_v15, %v479_v0  ;;  %488 = vlog2.f32 %v306_v13 }
 0x261   :  { %490 = vlog2.f32 %v307_v14 }
 0x262   :  { %v368_v18 = vadd.f32 %v367_v17, %v212_v16 }
 0x264   :  { %v378_v19 = vmul.f32 0.5, %v368_v18 }
 0x266   :  { %379 = vst.msk [vmem:[#allocation9] sm:$0xff] %vm200_vm2, %v378_v19 }
 0x267   :  { %569 = shalt.err (!%p566_p0)
}
 0x268   :  { %s570_s5 = scalar_lea.hbm %s724_s4, 128 }
 0x269   :  { %p571_p1 = scmp.ne.s32.totalorder %s724_s4, %s570_s5  ;;  %p574_p2 = scmp.lt.u32.totalorder %s570_s5, %s724_s4 }
 0x26b   :  { %p576_p3 = pnand %p574_p2, %p571_p1 }
 0x26d   :  { %579 = shalt.err (!%p576_p3)
}
 0x26e   :  { %399 = dma.vmem_to_hbm [thread:$0]  %s397_s27, 128, %s724_s4, [#allocation10]   ;;  %v489_v20 = vpop.eup %488 }
 0x26f   :  { %v491_v21 = vpop.eup %490  ;;  %v370_v22 = vmul.f32 0.6931472, %v489_v20  ;;  %s621_s12 = smov [#allocation8]  }
 0x270   :  { %s386_s1 = sshll.u32 %s621_s12, 4  ;;  %v372_v23 = vmul.f32 0.6931472, %v491_v21  ;;  %s387_s1 = int_to_ptr.vmem [resolvable:$true] %s386_s1 }
 0x271   :  { %v424_v24 = vadd.f32 -0.6931472, %v370_v22  ;;  %s580_s13 = scalar_lea.vmem %s387_s1, 256  ;;  %p585_p5 = scmp.lt.s32.totalorder %s387_s1, %s387_s1 }
 0x272   :  { %v425_v25 = vadd.f32 -0.6931472, %v372_v23  ;;  %p581_p4 = scmp.ne.s32.totalorder %s387_s1, %s580_s13  ;;  %p586_p6 = scmp.lt.s32.totalorder %s580_s13, %s580_s13 }
 0x273   :  { %375 = vst [vmem:[#allocation8] sm:$0xff] %v424_v24 }
 0x274   :  { %376 = vst [vmem:[#allocation8 + $0x8] sm:$0xff] %v425_v25  ;;  %p587_p7 = por %p586_p6, %p585_p5 }
 0x276   :  { %p588_p8 = pnand %p587_p7, %p581_p4 }
 0x278   :  { %591 = shalt.err (!%p588_p8)
}
 0x279   :  { %s592_s15 = scalar_lea.hbm %s723_s3, 256 }
 0x27a   :  { %p593_p9 = scmp.ne.s32.totalorder %s723_s3, %s592_s15  ;;  %p596_p10 = scmp.lt.u32.totalorder %s592_s15, %s723_s3 }
 0x27c   :  { %p598_p11 = pnand %p596_p10, %p593_p9 }
 0x27e   :  { %601 = shalt.err (!%p598_p11)
}
 0x27f   :  { %389 = dma.vmem_to_hbm [thread:$0]  %s387_s1, 256, %s723_s3, [#allocation4]  }
 0x280   :  { %606 = dma.done.wait [#allocation4], 256  }
 0x281   :  { %607 = vsyncadd [#allocation4], 4294967040 }
 0x282   :  { %608 = dma.done.wait [#allocation10], 128  }
 0x283   :  { %609 = vsyncadd [#allocation10], 4294967168 }
 0x284   :  { %406 = vsyncpa [#allocation3], 1 }
 0x285   :  { %407 = vsyncpa [#allocation6], 1 }
 0x286   :  { %408 = vsyncpa [#allocation4], 1 }
 0x287   :  { %409 = vsyncpa [#allocation10], 1 }

</bundles_post_ra>
